<compile_context>
chip_gen: v7x
topology: tpu7x:2x2x1
jax: 0.10.0
libtpu: 0.0.40
codegen_flags: <defaults>
</compile_context>

<pallas_src>
import functools

import jax
import jax.numpy as jnp
from jax.experimental import pallas as pl
from jax.experimental.pallas import tpu as pltpu


def _round_up(n, m):
    return ((n + m - 1) // m) * m


def mlp_kernel(x_ref, w1_ref, b1_ref, w2_ref, b2_ref, w3_ref, b3_ref, o_ref):
    # Fused 3-layer MLP; all operands for this batch tile are resident in VMEM.
    x = x_ref[...].astype(jnp.bfloat16)                              # (bb, 729)
    h1 = jnp.dot(x, w1_ref[...], preferred_element_type=jnp.float32)
    h1 = jnp.maximum(h1 + b1_ref[...], 0.0)                          # ReLU1
    # Dropout(p=0.1) is identity at inference time (module eval semantics).
    h2 = jnp.dot(h1.astype(jnp.bfloat16), w2_ref[...],
                 preferred_element_type=jnp.float32)
    h2 = jnp.maximum(h2 + b2_ref[...], 0.0)                          # ReLU2
    # fc3: (bb, 64) @ (64, 1) done as VPU multiply + XLU lane-reduce
    # (w3 passed as a (1, 64) f32 row) instead of a nearly-empty MXU matmul.
    z = jnp.sum(h2 * w3_ref[...], axis=-1, keepdims=True) + b3_ref[...]
    o_ref[...] = jax.nn.sigmoid(z)                                   # (bb, 1)


@functools.partial(jax.jit, static_argnames=("block_b",))
def mlp_forward(x, w1, b1, w2, b2, w3, b3, *, block_b=2048):
    """x: (B, 729); w1: (729,128); w2: (128,64); w3: (64,1); b*: (1, out)."""
    B, D_in = x.shape

    # Batch tile: no bigger than the (sublane-rounded) batch; once the batch
    # is worth pipelining, split it into >=2 balanced tiles so both v7x
    # TensorCores get work via the "parallel" grid axis.
    if B > 256:
        bb = min(block_b, _round_up(-(-B // 2), 8))
    else:
        bb = min(block_b, _round_up(B, 8))
    grid = pl.cdiv(B, bb)   # ragged last block: Pallas masks OOB output rows

    # bf16 weights for the MXU (f32 accumulation happens in-kernel); biases
    # and the fc3 VPU row stay f32.
    w1_bf = w1.astype(jnp.bfloat16)
    w2_bf = w2.astype(jnp.bfloat16)
    w3_row = w3.reshape(1, -1).astype(jnp.float32)   # (1, 64)

    full = lambda a: pl.BlockSpec(a.shape, lambda i: (0,) * a.ndim)

    out = pl.pallas_call(
        mlp_kernel,
        out_shape=jax.ShapeDtypeStruct((B, 1), jnp.float32),
        grid_spec=pltpu.PrefetchScalarGridSpec(
            num_scalar_prefetch=0,
            grid=(grid,),
            in_specs=[
                pl.BlockSpec((bb, D_in), lambda i: (i, 0)),   # x batch tile
                full(w1_bf),                                  # (729, 128) bf16
                full(b1),                                     # (1, 128)
                full(w2_bf),                                  # (128, 64) bf16
                full(b2),                                     # (1, 64)
                full(w3_row),                                 # (1, 64)
                full(b3),                                     # (1, 1)
            ],
            out_specs=pl.BlockSpec((bb, 1), lambda i: (i, 0)),
        ),
        compiler_params=pltpu.CompilerParams(
            dimension_semantics=("parallel",),
            vmem_limit_bytes=32 * 1024 * 1024,
        ),
    )(x, w1_bf, b1, w2_bf, b2, w3_row, b3)

    # torch.squeeze(out, dim=1)
    return jnp.squeeze(out, axis=1)


def _reference(x, w1, b1, w2, b2, w3, b3):
    h1 = jnp.maximum(x @ w1 + b1, 0.0)
    h2 = jnp.maximum(h1 @ w2 + b2, 0.0)
    return jnp.squeeze(jax.nn.sigmoid(h2 @ w3 + b3), axis=1)


def init_linear(key, fan_in, fan_out):
    # Deterministic PyTorch-style init: U(-1/sqrt(fan_in), 1/sqrt(fan_in)).
    kw, kb = jax.random.split(key)
    bound = 1.0 / jnp.sqrt(fan_in)
    w = jax.random.uniform(kw, (fan_in, fan_out), jnp.float32, -bound, bound)
    b = jax.random.uniform(kb, (1, fan_out), jnp.float32, -bound, bound)
    return w, b


if __name__ == "__main__":
    key = jax.random.PRNGKey(0)
    kx, k1, k2, k3, kx2, kx3 = jax.random.split(key, 6)

    w1, b1 = init_linear(k1, 729, 128)
    w2, b2 = init_linear(k2, 128, 64)
    w3, b3 = init_linear(k3, 64, 1)

    # bf16 matmul operands -> relaxed tolerance vs. the f32 reference
    # (fine for a sigmoid classifier head).
    TOL = 2e-2

    # Small demo batch: single tile / single grid step.
    B = 8
    x = jax.random.normal(kx, (B, 729), jnp.float32)
    out = jax.block_until_ready(mlp_forward(x, w1, b1, w2, b2, w3, b3))
    ref = _reference(x, w1, b1, w2, b2, w3, b3)
    assert out.shape == (B,)
    assert jnp.allclose(out, ref, atol=TOL), (out, ref)

    # Ragged batch exercising the multi-step pipelined grid with a masked
    # (out-of-bounds) last block — no host-side padding.
    B2 = 272
    x2 = jax.random.normal(kx2, (B2, 729), jnp.float32)
    out2 = jax.block_until_ready(
        mlp_forward(x2, w1, b1, w2, b2, w3, b3, block_b=128))
    ref2 = _reference(x2, w1, b1, w2, b2, w3, b3)
    assert out2.shape == (B2,)
    assert jnp.allclose(out2, ref2, atol=TOL), (out2, ref2)

    # Mid-size batch exercising the automatic split into 2 balanced tiles
    # (both v7x TensorCores) with a ragged last block.
    B3 = 520
    x3 = jax.random.normal(kx3, (B3, 729), jnp.float32)
    out3 = jax.block_until_ready(mlp_forward(x3, w1, b1, w2, b2, w3, b3))
    ref3 = _reference(x3, w1, b1, w2, b2, w3, b3)
    assert out3.shape == (B3,)
    assert jnp.allclose(out3, ref3, atol=TOL), (out3, ref3)

    print("KERNEL_OK")
</pallas_src>

<mosaic_0001>
module attributes {stable_mosaic.version = 11 : i64} {
  func.func @mlp_kernel(%arg0: i32, %arg1: memref<8x729xf32, #tpu.memory_space<vmem>>, %arg2: memref<729x128xbf16, #tpu.memory_space<vmem>>, %arg3: memref<1x128xf32, #tpu.memory_space<vmem>>, %arg4: memref<128x64xbf16, #tpu.memory_space<vmem>>, %arg5: memref<1x64xf32, #tpu.memory_space<vmem>>, %arg6: memref<1x64xf32, #tpu.memory_space<vmem>>, %arg7: memref<1x1xf32, #tpu.memory_space<vmem>>, %arg8: memref<8x1xf32, #tpu.memory_space<vmem>>) attributes {dimension_semantics = [#tpu.dimension_semantics<parallel>], iteration_bounds = array<i64: 1>, scalar_prefetch = 0 : i64, scratch_operands = 0 : i64, tpu.core_type = #tpu.core_type<tc>, window_params = [{transform_indices = @transform_0, window_bounds = array<i64: 8, 729>}, {pipeline_mode = #tpu.pipeline_mode<synchronous>, transform_indices = @transform_1, window_bounds = array<i64: 729, 128>}, {pipeline_mode = #tpu.pipeline_mode<synchronous>, transform_indices = @transform_2, window_bounds = array<i64: 1, 128>}, {pipeline_mode = #tpu.pipeline_mode<synchronous>, transform_indices = @transform_3, window_bounds = array<i64: 128, 64>}, {pipeline_mode = #tpu.pipeline_mode<synchronous>, transform_indices = @transform_4, window_bounds = array<i64: 1, 64>}, {pipeline_mode = #tpu.pipeline_mode<synchronous>, transform_indices = @transform_5, window_bounds = array<i64: 1, 64>}, {pipeline_mode = #tpu.pipeline_mode<synchronous>, transform_indices = @transform_6, window_bounds = array<i64: 1, 1>}, {transform_indices = @transform_7, window_bounds = array<i64: 8, 1>}]} {
    %c0 = arith.constant 0 : index
    %c0_0 = arith.constant 0 : index
    %0 = vector.load %arg1[%c0, %c0_0] : memref<8x729xf32, #tpu.memory_space<vmem>>, vector<8x729xf32>
    %1 = arith.truncf %0 : vector<8x729xf32> to vector<8x729xbf16>
    %c0_1 = arith.constant 0 : index
    %c0_2 = arith.constant 0 : index
    %2 = vector.load %arg2[%c0_1, %c0_2] : memref<729x128xbf16, #tpu.memory_space<vmem>>, vector<729x128xbf16>
    %cst = arith.constant dense<0.000000e+00> : vector<8x128xf32>
    %3 = tpu.matmul %1, %2, %cst {dimension_numbers = #tpu.dot_dimension_numbers<[1], [0], [0], [1], [0, 0, 1, 1], [], []>} : vector<8x729xbf16>, vector<729x128xbf16>, vector<8x128xf32> -> vector<8x128xf32>
    %c0_3 = arith.constant 0 : index
    %c0_4 = arith.constant 0 : index
    %4 = vector.load %arg3[%c0_3, %c0_4] : memref<1x128xf32, #tpu.memory_space<vmem>>, vector<1x128xf32>
    %5 = vector.broadcast %4 : vector<1x128xf32> to vector<8x128xf32>
    %6 = arith.addf %3, %5 : vector<8x128xf32>
    %cst_5 = arith.constant 0.000000e+00 : f32
    %7 = vector.broadcast %cst_5 : f32 to vector<8x128xf32>
    %8 = arith.maximumf %6, %7 : vector<8x128xf32>
    %9 = arith.truncf %8 : vector<8x128xf32> to vector<8x128xbf16>
    %c0_6 = arith.constant 0 : index
    %c0_7 = arith.constant 0 : index
    %10 = vector.load %arg4[%c0_6, %c0_7] : memref<128x64xbf16, #tpu.memory_space<vmem>>, vector<128x64xbf16>
    %cst_8 = arith.constant dense<0.000000e+00> : vector<8x64xf32>
    %11 = tpu.matmul %9, %10, %cst_8 {dimension_numbers = #tpu.dot_dimension_numbers<[1], [0], [0], [1], [0, 0, 1, 1], [], []>} : vector<8x128xbf16>, vector<128x64xbf16>, vector<8x64xf32> -> vector<8x64xf32>
    %c0_9 = arith.constant 0 : index
    %c0_10 = arith.constant 0 : index
    %12 = vector.load %arg5[%c0_9, %c0_10] : memref<1x64xf32, #tpu.memory_space<vmem>>, vector<1x64xf32>
    %13 = vector.broadcast %12 : vector<1x64xf32> to vector<8x64xf32>
    %14 = arith.addf %11, %13 : vector<8x64xf32>
    %cst_11 = arith.constant 0.000000e+00 : f32
    %15 = vector.broadcast %cst_11 : f32 to vector<8x64xf32>
    %16 = arith.maximumf %14, %15 : vector<8x64xf32>
    %c0_12 = arith.constant 0 : index
    %c0_13 = arith.constant 0 : index
    %17 = vector.load %arg6[%c0_12, %c0_13] : memref<1x64xf32, #tpu.memory_space<vmem>>, vector<1x64xf32>
    %18 = vector.broadcast %17 : vector<1x64xf32> to vector<8x64xf32>
    %19 = arith.mulf %16, %18 : vector<8x64xf32>
    %cst_14 = arith.constant dense<0.000000e+00> : vector<8xf32>
    %20 = vector.multi_reduction <add>, %19, %cst_14 [1] : vector<8x64xf32> to vector<8xf32>
    %21 = vector.shape_cast %20 : vector<8xf32> to vector<8x1xf32>
    %c0_15 = arith.constant 0 : index
    %c0_16 = arith.constant 0 : index
    %22 = vector.load %arg7[%c0_15, %c0_16] : memref<1x1xf32, #tpu.memory_space<vmem>>, vector<1x1xf32>
    %23 = vector.broadcast %22 : vector<1x1xf32> to vector<8x1xf32>
    %24 = arith.addf %21, %23 : vector<8x1xf32>
    %25 = arith.negf %24 : vector<8x1xf32>
    %26 = math.exp %25 : vector<8x1xf32>
    %cst_17 = arith.constant 1.000000e+00 : f32
    %27 = vector.broadcast %cst_17 : f32 to vector<8x1xf32>
    %28 = arith.addf %27, %26 : vector<8x1xf32>
    %29 = arith.divf %27, %28 : vector<8x1xf32>
    %c0_18 = arith.constant 0 : index
    %c0_19 = arith.constant 0 : index
    %30 = vector.load %arg8[%c0_18, %c0_19] : memref<8x1xf32, #tpu.memory_space<vmem>>, vector<8x1xf32>
    tpu.vector_store %arg8[%c0_18, %c0_19], %29 {strides = array<i32>} : memref<8x1xf32, #tpu.memory_space<vmem>>, vector<8x1xf32>,
    return
  }
  func.func @transform_0(%arg0: i32) -> (i32, i32) {
    %c0_i32 = arith.constant 0 : i32
    %c0_i32_0 = arith.constant 0 : i32
    return %arg0, %c0_i32 : i32, i32
  }
  func.func @transform_1(%arg0: i32) -> (i32, i32) {
    %c0_i32 = arith.constant 0 : i32
    %c0_i32_0 = arith.constant 0 : i32
    %c0_i32_1 = arith.constant 0 : i32
    return %c0_i32, %c0_i32_0 : i32, i32
  }
  func.func @transform_2(%arg0: i32) -> (i32, i32) {
    %c0_i32 = arith.constant 0 : i32
    %c0_i32_0 = arith.constant 0 : i32
    %c0_i32_1 = arith.constant 0 : i32
    return %c0_i32, %c0_i32_0 : i32, i32
  }
  func.func @transform_3(%arg0: i32) -> (i32, i32) {
    %c0_i32 = arith.constant 0 : i32
    %c0_i32_0 = arith.constant 0 : i32
    %c0_i32_1 = arith.constant 0 : i32
    return %c0_i32, %c0_i32_0 : i32, i32
  }
  func.func @transform_4(%arg0: i32) -> (i32, i32) {
    %c0_i32 = arith.constant 0 : i32
    %c0_i32_0 = arith.constant 0 : i32
    %c0_i32_1 = arith.constant 0 : i32
    return %c0_i32, %c0_i32_0 : i32, i32
  }
  func.func @transform_5(%arg0: i32) -> (i32, i32) {
    %c0_i32 = arith.constant 0 : i32
    %c0_i32_0 = arith.constant 0 : i32
    %c0_i32_1 = arith.constant 0 : i32
    return %c0_i32, %c0_i32_0 : i32, i32
  }
  func.func @transform_6(%arg0: i32) -> (i32, i32) {
    %c0_i32 = arith.constant 0 : i32
    %c0_i32_0 = arith.constant 0 : i32
    %c0_i32_1 = arith.constant 0 : i32
    return %c0_i32, %c0_i32_0 : i32, i32
  }
  func.func @transform_7(%arg0: i32) -> (i32, i32) {
    %c0_i32 = arith.constant 0 : i32
    %c0_i32_0 = arith.constant 0 : i32
    return %arg0, %c0_i32 : i32, i32
  }
}

</mosaic_0001>

<bundles_post_ra>
// kernel: mlp_forward.1
= control target key start
LH: loop header
LB: loop body
LE: loop exit
PB: predicated region body
PF: predicated region fallthrough
CT: control target
= control target key end

     0   :  { %v887_v35 = vmov 0   ;;  %vm415_vm0 = vcmask 728064   ;;  %vm419_vm1 = vcmask 1043456   ;;  %vm420_vm2 = vcmask 1044480   ;;  %s1126_s1 = inlined_call_operand.vmem [shape: bf16[729,128], index: 1, kind: input, shape index: {}]   ;;  %s1127_s0 = inlined_call_operand.vmem [shape: f32[8,729], index: 0, kind: input, shape index: {}]   ;;  %s1128_s3 = inlined_call_operand.vmem [shape: bf16[128,64], index: 3, kind: input, shape index: {}]   ;;  %s1129_s2 = inlined_call_operand.vmem [shape: f32[1,128], index: 2, kind: input, shape index: {}]   ;;  %s1130_s6 = inlined_call_operand.<no memory space> [shape: f32[1,1], index: 6, kind: input, shape index: {}]   ;;  %s1131_s4 = inlined_call_operand.vmem [shape: f32[1,64], index: 4, kind: input, shape index: {}]   ;;  %s1132_s5 = inlined_call_operand.vmem [shape: f32[1,64], index: 5, kind: input, shape index: {}]   ;;  %s1133_s7 = inlined_call_operand.vmem [shape: f32[8,1], index: 7, kind: output, shape index: {}]  }
   0x1   :  { %v829_v0 = vld [vmem:[%s1126_s1 + $0x40] sm:$0xff]   ;;  %v833_v4 = vld [vmem:[%s1126_s1 + $0x48] sm:$0xff]   ;;  %v837_v8 = vld [vmem:[%s1126_s1 + $0x50] sm:$0xff]   ;;  %v888_v55 = vmov 65535   ;;  %v889_v63 = vmov 0.0   ;;  %vm890_vm3 = vmmov 0  }
   0x2   :  { %v830_v1 = vld [vmem:[%s1126_s1] sm:$0xff]   ;;  %752 = vmatprep.subr.bf16.mxu0 %v829_v0  ;;  %v834_v5 = vld [vmem:[%s1126_s1 + $0x8] sm:$0xff]   ;;  %v838_v9 = vld [vmem:[%s1126_s1 + $0x10] sm:$0xff]   ;;  %v421_v56 = vsel %vm419_vm1, 4294967295, %v888_v55  ;;  %vm668_vm4 = vcmask 523264   ;;  %vm686_vm5 = vcmask 7168  }
   0x3   :  { %v831_v2 = vld [vmem:[%s1126_s1 + $0xc0] sm:$0xff]   ;;  %753 = vmatpush3.bf16.msra.mxu0 %v830_v1  ;;  %v835_v6 = vld [vmem:[%s1126_s1 + $0xc8] sm:$0xff]   ;;  %v839_v10 = vld [vmem:[%s1126_s1 + $0xd0] sm:$0xff]   ;;  %v422_v59 = vsel %vm420_vm2, %v421_v56, 0 }
   0x4   :  { %v832_v3 = vld [vmem:[%s1126_s1 + $0x80] sm:$0xff]   ;;  %774 = vmatprep.subr.bf16.mxu1 %v831_v2  ;;  %754 = vmatprep.subr.bf16.mxu0 %v833_v4  ;;  %v836_v7 = vld [vmem:[%s1126_s1 + $0x88] sm:$0xff]   ;;  %v840_v11 = vld [vmem:[%s1126_s1 + $0x90] sm:$0xff]  }
   0x5   :  { %775 = vmatpush3.bf16.msra.mxu1 %v832_v3  ;;  %v841_v12 = vld [vmem:[%s1126_s1 + $0x58] sm:$0xff]   ;;  %v845_v16 = vld [vmem:[%s1126_s1 + $0x60] sm:$0xff]   ;;  %v849_v20 = vld [vmem:[%s1126_s1 + $0x68] sm:$0xff]  }
   0x6   :  { %776 = vmatprep.subr.bf16.mxu1 %v835_v6  ;;  %v842_v13 = vld [vmem:[%s1126_s1 + $0x18] sm:$0xff]   ;;  %v846_v17 = vld [vmem:[%s1126_s1 + $0x20] sm:$0xff]   ;;  %v850_v21 = vld [vmem:[%s1126_s1 + $0x28] sm:$0xff]  }
   0x7   :  { %755 = vmatpush3.bf16.msra.mxu0 %v834_v5  ;;  %v843_v14 = vld [vmem:[%s1126_s1 + $0xd8] sm:$0xff]   ;;  %v847_v18 = vld [vmem:[%s1126_s1 + $0xe0] sm:$0xff]   ;;  %v851_v22 = vld [vmem:[%s1126_s1 + $0xe8] sm:$0xff]  }
   0x8   :  { %756 = vmatprep.subr.bf16.mxu0 %v837_v8  ;;  %v844_v15 = vld [vmem:[%s1126_s1 + $0x98] sm:$0xff]   ;;  %v848_v19 = vld [vmem:[%s1126_s1 + $0xa0] sm:$0xff]   ;;  %v852_v23 = vld [vmem:[%s1126_s1 + $0xa8] sm:$0xff]  }
   0x9   :  { %777 = vmatpush3.bf16.msra.mxu1 %v836_v7  ;;  %v853_v24 = vld [vmem:[%s1126_s1 + $0x70] sm:$0xff]   ;;  %v857_v28 = vld [vmem:[%s1126_s1 + $0x78] sm:$0xff]   ;;  %v30_v31 = vld [vmem:[%s1127_s0 + $0x8] sm:$0xff] }
   0xa   :  { %778 = vmatprep.subr.bf16.mxu1 %v839_v10  ;;  %v854_v25 = vld [vmem:[%s1126_s1 + $0x30] sm:$0xff]   ;;  %v858_v29 = vld [vmem:[%s1126_s1 + $0x38] sm:$0xff]   ;;  %v36_v32 = vpack.c.bf16 %v30_v31, %v30_v31  ;;  %v29_v34 = vld [vmem:[%s1127_s0] sm:$0xff] }
   0xb   :  { %757 = vmatpush3.bf16.msra.mxu0 %v838_v9  ;;  %v855_v26 = vld [vmem:[%s1126_s1 + $0xf0] sm:$0xff]   ;;  %v859_v30 = vld [vmem:[%s1126_s1 + $0xf8] sm:$0xff]   ;;  %v35_v37 = vpack.c.bf16 %v29_v34, %v29_v34  ;;  %v861_v39 = vld [vmem:[%s1126_s1 + $0x100] sm:$0xff]  }
   0xc   :  { %758 = vmatprep.subr.bf16.mxu0 %v841_v12  ;;  %v856_v27 = vld [vmem:[%s1126_s1 + $0xb0] sm:$0xff]   ;;  %v860_v33 = vld [vmem:[%s1126_s1 + $0xb8] sm:$0xff]   ;;  %458 = vmatprep.mubr.bf16.mxu0 %v36_v32  ;;  %v862_v42 = vld [vmem:[%s1126_s1 + $0x108] sm:$0xff]  }
   0xd   :  { %779 = vmatpush3.bf16.msra.mxu1 %v840_v11  ;;  %v32_v36 = vld [vmem:[%s1127_s0 + $0x18] sm:$0xff]  ;;  %v31_v40 = vld [vmem:[%s1127_s0 + $0x10] sm:$0xff]  ;;  %v34_v45 = vld [vmem:[%s1127_s0 + $0x28] sm:$0xff] }
   0xe   :  { %780 = vmatprep.subr.bf16.mxu1 %v843_v14  ;;  %v38_v38 = vpack.c.bf16 %v32_v36, %v32_v36  ;;  %v37_v41 = vpack.c.bf16 %v31_v40, %v31_v40  ;;  %v863_v43 = vld [vmem:[%s1126_s1 + $0x110] sm:$0xff]   ;;  %v864_v44 = vld [vmem:[%s1126_s1 + $0x118] sm:$0xff]   ;;  %v865_v46 = vld [vmem:[%s1126_s1 + $0x120] sm:$0xff]   ;;  %v40_v47 = vpack.c.bf16 %v34_v45, %v34_v45 }
   0xf   :  { %759 = vmatpush3.bf16.msra.mxu0 %v842_v13  ;;  %v866_v48 = vld [vmem:[%s1126_s1 + $0x128] sm:$0xff]   ;;  %v867_v49 = vld [vmem:[%s1126_s1 + $0x130] sm:$0xff]   ;;  %v868_v50 = vld [vmem:[%s1126_s1 + $0x138] sm:$0xff]  }
  0x10   :  { %760 = vmatprep.subr.bf16.mxu0 %v845_v16  ;;  %498 = vmatprep.mubr.bf16.mxu1 %v38_v38  ;;  %v869_v51 = vld [vmem:[%s1126_s1 + $0x140] sm:$0xff]   ;;  %v870_v52 = vld [vmem:[%s1126_s1 + $0x148] sm:$0xff]   ;;  %v871_v53 = vld [vmem:[%s1126_s1 + $0x150] sm:$0xff]  }
  0x11   :  { %781 = vmatpush3.bf16.msra.mxu1 %v844_v15  ;;  %v872_v54 = vld [vmem:[%s1126_s1 + $0x158] sm:$0xff]   ;;  %v873_v57 = vld [vmem:[%s1126_s1 + $0x160] sm:$0xff]   ;;  %v874_v58 = vld [vmem:[%s1126_s1 + $0x168] sm:$0x1f]  }
  0x12   :  { %782 = vmatprep.subr.bf16.mxu1 %v847_v18  ;;  %v424_v60 = vand.u32 %v874_v58, %v422_v59  ;;  %v33_v61 = vld [vmem:[%s1127_s0 + $0x20] sm:$0xff]  ;;  %v876_v1 = vld [vmem:[%s1128_s3 + $0x8] sm:$0xff]   ;;  %v877_v2 = vld [vmem:[%s1128_s3 + $0x10] sm:$0xff]  }
  0x13   :  { %761 = vmatpush3.bf16.msra.mxu0 %v846_v17  ;;  %v39_v62 = vpack.c.bf16 %v33_v61, %v33_v61  ;;  %v875_v0 = vld [vmem:[%s1128_s3] sm:$0xff]   ;;  %v878_v3 = vld [vmem:[%s1128_s3 + $0x18] sm:$0xff]   ;;  %v880_v5 = vld [vmem:[%s1128_s3 + $0x28] sm:$0xff]  }
  0x14   :  { %762 = vmatprep.subr.bf16.mxu0 %v849_v20  ;;  %v879_v4 = vld [vmem:[%s1128_s3 + $0x20] sm:$0xff]   ;;  %v881_v6 = vld [vmem:[%s1128_s3 + $0x30] sm:$0xff]   ;;  %v882_v7 = vld [vmem:[%s1128_s3 + $0x38] sm:$0xff]  }
  0x15   :  { %783 = vmatpush3.bf16.msra.mxu1 %v848_v19  ;;  %v692_v9 = vld [vmem:[%s1129_s2] ss:$0 sm:$0xff] }
  0x16   :  { %784 = vmatprep.subr.bf16.mxu1 %v851_v22  ;;  %v749_v34 = vld [vmem:[%s1132_s5] ss:$0 sm:$0xff] }
  0x17   :  { %763 = vmatpush3.bf16.msra.mxu0 %v850_v21 }
  0x18   :  { %764 = vmatprep.subr.bf16.mxu0 %v853_v24 }
  0x19   :  { %785 = vmatpush3.bf16.msra.mxu1 %v852_v23 }
  0x1a   :  { %786 = vmatprep.subr.bf16.mxu1 %v855_v26 }
  0x1b   :  { %765 = vmatpush3.bf16.msra.mxu0 %v854_v25 }
  0x1c   :  { %766 = vmatprep.subr.bf16.mxu0 %v857_v28  ;;  %v12_v28 = vstv %s1130_s6 }
  0x1d   :  { %787 = vmatpush3.bf16.msra.mxu1 %v856_v27  ;;  %13 = vst [vmem:[#allocation2] sm:$0x1] %v12_v28 }
  0x1e   :  { %788 = vmatprep.subr.bf16.mxu1 %v859_v30 }
  0x1f   :  { %767 = vmatpush3.bf16.msra.mxu0 %v858_v29  ;;  %v740_v29 = vld [vmem:[%s1131_s4] ss:$0 sm:$0xff] }
  0x20   :  { %506 = vmatprep.subr.bf16.mxu0 %v887_v35 }
  0x21   :  { %789 = vmatpush3.bf16.msra.mxu1 %v860_v33 }
  0x22   :  { %459 = vmatmul.mubr.bf16.vlgmr.msra.gmra.mrb[0].mxu0 %v35_v37  ;;  %805 = vmatprep.subr.bf16.mxu1 %v889_v63 }
  0x23   :  { %507 = vmatpush1.bf16.msra.mxu0 %v861_v39  ;;  %739 = vmatprep.mubr.msk.bf16.mxu0 %vm415_vm0, %v40_v47 }
  0x24   :  { %499 = vmatmul.mubr.bf16.vlgmr.msra.gmra.mrb[0].mxu1 %v37_v41  ;;  %508 = vmatprep.subr.bf16.mxu0 %v887_v35  ;;  %v750_v39 = vld [vmem:[#allocation2] ss:$0 sm:$0xff] }
  0x25   :  { %806 = vmatpush3.bf16.msra.mxu1 %v875_v0  ;;  %821 = vmatprep.mubr.msk.bf16.mxu1 %vm890_vm3, %v889_v63 }
  0x26   :  { %807 = vmatprep.subr.bf16.mxu1 %v889_v63 }
  0x27   :  { %509 = vmatpush1.bf16.msra.mxu0 %v862_v42 }
  0x28   :  { %510 = vmatprep.subr.bf16.mxu0 %v887_v35 }
  0x29   :  { %808 = vmatpush3.bf16.msra.mxu1 %v876_v1 }
  0x2a   :  { %809 = vmatprep.subr.bf16.mxu1 %v889_v63 }
  0x2b   :  { %511 = vmatpush1.bf16.msra.mxu0 %v863_v43 }
  0x2c   :  { %512 = vmatprep.subr.bf16.mxu0 %v887_v35 }
  0x2d   :  { %810 = vmatpush3.bf16.msra.mxu1 %v877_v2 }
  0x2e   :  { %811 = vmatprep.subr.bf16.mxu1 %v889_v63 }
  0x2f   :  { %513 = vmatpush1.bf16.msra.mxu0 %v864_v44 }
  0x30   :  { %514 = vmatprep.subr.bf16.mxu0 %v887_v35 }
  0x31   :  { %812 = vmatpush3.bf16.msra.mxu1 %v878_v3 }
  0x32   :  { %813 = vmatprep.subr.bf16.mxu1 %v889_v63 }
  0x33   :  { %515 = vmatpush1.bf16.msra.mxu0 %v865_v46 }
  0x34   :  { %516 = vmatprep.subr.bf16.mxu0 %v887_v35 }
  0x35   :  { %814 = vmatpush3.bf16.msra.mxu1 %v879_v4 }
  0x36   :  { %815 = vmatprep.subr.bf16.mxu1 %v889_v63 }
  0x37   :  { %517 = vmatpush1.bf16.msra.mxu0 %v866_v48 }
  0x38   :  { %518 = vmatprep.subr.bf16.mxu0 %v887_v35 }
  0x39   :  { %816 = vmatpush3.bf16.msra.mxu1 %v880_v5 }
  0x3a   :  { %817 = vmatprep.subr.bf16.mxu1 %v889_v63 }
  0x3b   :  { %519 = vmatpush1.bf16.msra.mxu0 %v867_v49 }
  0x3c   :  { %520 = vmatprep.subr.bf16.mxu0 %v887_v35 }
  0x3d   :  { %818 = vmatpush3.bf16.msra.mxu1 %v881_v6 }
  0x3e   :  { %819 = vmatprep.subr.bf16.mxu1 %v889_v63 }
  0x3f   :  { %521 = vmatpush1.bf16.msra.mxu0 %v868_v50 }
  0x40   :  { %522 = vmatprep.subr.bf16.mxu0 %v887_v35 }
  0x41   :  { %820 = vmatpush3.bf16.msra.mxu1 %v882_v7 }
  0x43   :  { %523 = vmatpush1.bf16.msra.mxu0 %v869_v51 }
  0x44   :  { %524 = vmatprep.subr.bf16.mxu0 %v887_v35 }
  0x47   :  { %525 = vmatpush1.bf16.msra.mxu0 %v870_v52 }
  0x48   :  { %526 = vmatprep.subr.bf16.mxu0 %v887_v35 }
  0x4b   :  { %527 = vmatpush1.bf16.msra.mxu0 %v871_v53 }
  0x4c   :  { %528 = vmatprep.subr.bf16.mxu0 %v887_v35 }
  0x4f   :  { %529 = vmatpush1.bf16.msra.mxu0 %v872_v54 }
  0x50   :  { %530 = vmatprep.subr.bf16.mxu0 %v887_v35 }
  0x53   :  { %531 = vmatpush1.bf16.msra.mxu0 %v873_v57 }
  0x54   :  { %532 = vmatprep.subr.bf16.mxu0 %v887_v35 }
  0x57   :  { %533 = vmatpush1.bf16.msra.mxu0 %v424_v60 }
  0x5a   :  { %539 = vmatmul.mubr.bf16.vlgmr.msra.gmra.mrb[4].mxu0 %v39_v62 }
  0xf5   :  { %v768_v8 = vpop.f32.mrb[0].mxu0 }
  0xf6   :  { %v769_v10 = vpop.f32.mrb[1].mxu0 }
  0xf7   :  { %v770_v11 = vadd.f32 %v769_v10, %v768_v8  ;;  %v771_v12 = vpop.f32.mrb[2].mxu0  ;;  %v790_v13 = vpop.f32.mrb[0].mxu1 }
  0xf8   :  { %v772_v14 = vpop.f32.mrb[3].mxu0  ;;  %v791_v15 = vpop.f32.mrb[1].mxu1 }
  0xf9   :  { %v461_v16 = vadd.f32 %v770_v11, %v692_v9  ;;  %v792_v17 = vadd.f32 %v791_v15, %v790_v13  ;;  %v793_v18 = vpop.f32.mrb[2].mxu1 }
  0xfa   :  { %v794_v19 = vpop.f32.mrb[3].mxu1 }
  0xfb   :  { %v501_v20 = vadd.f32 %v792_v17, %v461_v16 }
 0x12d   :  { %v540_v21 = vpop.f32.mrb[4].mxu0 }
 0x12e   :  { %v541_v22 = vadd.f32 %v540_v21, %v501_v20  ;;  %v542_v23 = vpop.f32.mrb[5].mxu0 }
 0x12f   :  { %v543_v24 = vpop.f32.mrb[6].mxu0 }
 0x130   :  { %v546_v25 = vmax.f32 %v541_v22, 0.0  ;;  %v544_v26 = vpop.f32.mrb[7].mxu0 }
 0x132   :  { %v547_v27 = vpack.c.bf16 %v546_v25, %v546_v25 }
 0x134   :  { %822 = vmatmul.mubr.bf16.vlgmr.msra.gmra.mrb[4].mxu1 %v547_v27 }
 0x207   :  { %v653_v30 = vpop.f32.mrb[4].mxu1 }
 0x208   :  { %v654_v31 = vadd.f32 %v740_v29, %v653_v30  ;;  %v823_v32 = vpop.f32.mrb[5].mxu1 }
 0x209   :  { %v656_v33 = vpop.f32.mrb[6].mxu1 }
 0x20a   :  { %v659_v35 = vmax.f32 %v654_v31, 0.0  ;;  %v824_v36 = vpop.f32.mrb[7].mxu1 }
 0x20c   :  { %v667_v37 = vmul.f32 %v749_v34, %v659_v35 }
 0x20e   :  { %v669_v38 = vsel %vm668_vm4, %v667_v37, 0.0 }
 0x20f   :  { %670 = vadd.xlane.f32.xlu0 %v669_v38 }
 0x29c   :  { %v671_v40 = vpop.xlane.xlu0 %670 }
 0x29d   :  { %v679_v41 = vadd.f32 %v750_v39, %v671_v40 }
 0x29f   :  { %v751_v42 = vmul.f32 -1.442695, %v679_v41 }
 0x2a1   :  { %883 = vpow2.f32 %v751_v42 }
 0x2ab   :  { %v884_v43 = vpop.eup %883 }
 0x2ac   :  { %v683_v44 = vadd.f32 1.0, %v884_v43 }
 0x2ae   :  { %885 = vrcp.f32 %v683_v44 }
 0x2b8   :  { %v886_v45 = vpop.eup %885 }
 0x2b9   :  { %687 = vst.msk [vmem:[%s1133_s7] sm:$0xff] %vm686_vm5, %v886_v45 }

</bundles_post_ra>
